<compile_context>
chip_gen: v6e
topology: v6e:2x2x1
jax: 0.10.0
libtpu: 0.0.40
codegen_flags: <defaults>
</compile_context>

<pallas_src>
import functools

import jax
import jax.numpy as jnp
from jax import lax
from jax.experimental import pallas as pl
from jax.experimental.pallas import tpu as pltpu


def _round_up(x, m):
    return (x + m - 1) // m * m


def _conv1x1_kernel(x_ref, w_ref, b_ref, o_ref):
    # x_ref: (1, Cin_p, t_hw) f32  -- one image's spatial tile, channels on sublanes
    # w_ref: (Cout_p, Cin_p) f32   -- resident weights
    # b_ref: (Cout_p, 1) f32       -- resident bias (broadcast over lanes)
    # o_ref: (1, Cout_p, t_hw) f32 -- lane-dense store (t_hw multiple of 128)
    y = jnp.dot(w_ref[...], x_ref[0], preferred_element_type=jnp.float32)
    o_ref[0] = (y + b_ref[...]).astype(o_ref.dtype)


@functools.partial(jax.jit, static_argnames=("t_hw",))
def out_conv(x_nchw, weight, bias, *, t_hw=2048):
    """Forward of OutConv: 1x1 Conv2d with bias, NCHW in / NCHW out (f32).

    x_nchw: (N, Cin, H, W) f32
    weight: (Cout, Cin, 1, 1) f32  (PyTorch OIHW layout)
    bias:   (Cout,) f32
    returns (N, Cout, H, W) f32
    """
    N, Cin, H, W = x_nchw.shape
    Cout = weight.shape[0]
    HW = H * W

    # Sublane-minimum channel padding (no-op when channels are already multiples of 8).
    Cin_p = _round_up(Cin, 8)
    Cout_p = _round_up(Cout, 8)
    # Lane tile: a multiple of 128, capped so small images use a single tile.
    t_hw = max(128, min(t_hw, _round_up(HW, 128)))
    HWp = _round_up(HW, t_hw)

    # (N, Cin, H, W) -> (N, Cin, HW): contiguous reshape; pads elided when zero.
    x_mat = x_nchw.reshape(N, Cin, HW)
    x_mat = jnp.pad(x_mat, ((0, 0), (0, Cin_p - Cin), (0, HWp - HW)))

    # (Cout, Cin, 1, 1) -> (Cout_p, Cin_p); (Cout,) -> (Cout_p, 1)
    w_mat = jnp.pad(weight[:, :, 0, 0], ((0, Cout_p - Cout), (0, Cin_p - Cin)))
    b_col = jnp.pad(bias, (0, Cout_p - Cout)).reshape(Cout_p, 1)

    grid = (N, HWp // t_hw)

    out = pl.pallas_call(
        _conv1x1_kernel,
        out_shape=jax.ShapeDtypeStruct((N, Cout_p, HWp), jnp.float32),
        grid=grid,
        in_specs=[
            pl.BlockSpec((1, Cin_p, t_hw), lambda n, j: (n, 0, j)),
            pl.BlockSpec((Cout_p, Cin_p), lambda n, j: (0, 0)),   # resident weights
            pl.BlockSpec((Cout_p, 1), lambda n, j: (0, 0)),       # resident bias
        ],
        out_specs=pl.BlockSpec((1, Cout_p, t_hw), lambda n, j: (n, 0, j)),
        compiler_params=pltpu.CompilerParams(
            # Independent (image, spatial-tile) work items -> shards across both
            # TensorCores on v7x; harmless on single-TC v5e/v6e.
            dimension_semantics=("parallel", "parallel"),
        ),
    )(x_mat, w_mat, b_col)

    # Slices are no-ops (elided by XLA) when no padding was needed.
    return out[:, :Cout, :HW].reshape(N, Cout, H, W)


def _reference(x_nchw, weight, bias):
    # Pure-JAX reference with exact PyTorch forward semantics (f32, HIGHEST precision).
    y = lax.conv_general_dilated(
        x_nchw, weight, window_strides=(1, 1), padding="VALID",
        dimension_numbers=("NCHW", "OIHW", "NCHW"),
        precision=lax.Precision.HIGHEST)
    return y + bias.reshape(1, -1, 1, 1)


if __name__ == "__main__":
    key = jax.random.PRNGKey(0)
    kx, kw, kb = jax.random.split(key, 3)

    # Small shapes consistent with OutConv: batch=2, in_channels=4, out_channels=4, 16x16.
    N, CIN, COUT, H, W = 2, 4, 4, 16, 16
    x = jax.random.normal(kx, (N, CIN, H, W), jnp.float32)
    bound = float(1.0 / (CIN ** 0.5))  # PyTorch Conv2d default init range (k = 1/(Cin*1*1))
    w = jax.random.uniform(kw, (COUT, CIN, 1, 1), jnp.float32, -bound, bound)
    b = jax.random.uniform(kb, (COUT,), jnp.float32, -bound, bound)

    out = jax.block_until_ready(out_conv(x, w, b))
    assert out.shape == (N, COUT, H, W), out.shape

    # f32 operands end-to-end -> tight parity with the exact f32 reference.
    ref = jax.block_until_ready(_reference(x, w, b))
    err = float(jnp.max(jnp.abs(out - ref)))
    assert jnp.allclose(out, ref, rtol=1e-4, atol=1e-4), err

    print("KERNEL_OK")
</pallas_src>

<mosaic_0001>
module attributes {stable_mosaic.version = 11 : i64} {
  func.func @_conv1x1_kernel(%arg0: i32, %arg1: i32, %arg2: memref<1x8x256xf32, #tpu.memory_space<vmem>>, %arg3: memref<8x8xf32, #tpu.memory_space<vmem>>, %arg4: memref<8x1xf32, #tpu.memory_space<vmem>>, %arg5: memref<1x8x256xf32, #tpu.memory_space<vmem>>) attributes {dimension_semantics = [#tpu.dimension_semantics<parallel>, #tpu.dimension_semantics<parallel>], iteration_bounds = array<i64: 2, 1>, scalar_prefetch = 0 : i64, scratch_operands = 0 : i64, tpu.core_type = #tpu.core_type<tc>, window_params = [{transform_indices = @transform_0, window_bounds = array<i64: 1, 8, 256>}, {pipeline_mode = #tpu.pipeline_mode<synchronous>, transform_indices = @transform_1, window_bounds = array<i64: 8, 8>}, {pipeline_mode = #tpu.pipeline_mode<synchronous>, transform_indices = @transform_2, window_bounds = array<i64: 8, 1>}, {transform_indices = @transform_3, window_bounds = array<i64: 1, 8, 256>}]} {
    %c0 = arith.constant 0 : index
    %c0_0 = arith.constant 0 : index
    %0 = vector.load %arg3[%c0, %c0_0] : memref<8x8xf32, #tpu.memory_space<vmem>>, vector<8x8xf32>
    %c0_1 = arith.constant 0 : index
    %c0_2 = arith.constant 0 : index
    %c0_3 = arith.constant 0 : index
    %1 = vector.load %arg2[%c0_1, %c0_2, %c0_3] : memref<1x8x256xf32, #tpu.memory_space<vmem>>, vector<1x8x256xf32>
    %2 = vector.shape_cast %1 : vector<1x8x256xf32> to vector<8x256xf32>
    %cst = arith.constant dense<0.000000e+00> : vector<8x256xf32>
    %3 = tpu.matmul %0, %2, %cst {dimension_numbers = #tpu.dot_dimension_numbers<[1], [0], [0], [1], [0, 0, 1, 1], [], []>} : vector<8x8xf32>, vector<8x256xf32>, vector<8x256xf32> -> vector<8x256xf32>
    %c0_4 = arith.constant 0 : index
    %c0_5 = arith.constant 0 : index
    %4 = vector.load %arg4[%c0_4, %c0_5] : memref<8x1xf32, #tpu.memory_space<vmem>>, vector<8x1xf32>
    %5 = vector.broadcast %4 : vector<8x1xf32> to vector<8x256xf32>
    %6 = arith.addf %3, %5 : vector<8x256xf32>
    %c0_6 = arith.constant 0 : index
    %c0_7 = arith.constant 0 : index
    %c0_8 = arith.constant 0 : index
    %7 = vector.load %arg5[%c0_6, %c0_7, %c0_8] : memref<1x8x256xf32, #tpu.memory_space<vmem>>, vector<1x8x256xf32>
    %8 = vector.shape_cast %7 : vector<1x8x256xf32> to vector<8x256xf32>
    %9 = vector.shape_cast %6 : vector<8x256xf32> to vector<1x8x256xf32>
    tpu.vector_store %arg5[%c0_6, %c0_7, %c0_8], %9 {strides = array<i32>} : memref<1x8x256xf32, #tpu.memory_space<vmem>>, vector<1x8x256xf32>,
    return
  }
  func.func @transform_0(%arg0: i32, %arg1: i32) -> (i32, i32, i32) {
    %c0_i32 = arith.constant 0 : i32
    %c0_i32_0 = arith.constant 0 : i32
    return %arg0, %c0_i32, %arg1 : i32, i32, i32
  }
  func.func @transform_1(%arg0: i32, %arg1: i32) -> (i32, i32) {
    %c0_i32 = arith.constant 0 : i32
    %c0_i32_0 = arith.constant 0 : i32
    %c0_i32_1 = arith.constant 0 : i32
    return %c0_i32, %c0_i32_0 : i32, i32
  }
  func.func @transform_2(%arg0: i32, %arg1: i32) -> (i32, i32) {
    %c0_i32 = arith.constant 0 : i32
    %c0_i32_0 = arith.constant 0 : i32
    %c0_i32_1 = arith.constant 0 : i32
    return %c0_i32, %c0_i32_0 : i32, i32
  }
  func.func @transform_3(%arg0: i32, %arg1: i32) -> (i32, i32, i32) {
    %c0_i32 = arith.constant 0 : i32
    %c0_i32_0 = arith.constant 0 : i32
    return %arg0, %c0_i32, %arg1 : i32, i32, i32
  }
}

</mosaic_0001>

<bundles_post_ra>
// kernel: out_conv.1
= control target key start
LH: loop header
LB: loop body
LE: loop exit
PB: predicated region body
PF: predicated region fallthrough
CT: control target
= control target key end

     0   :  { %s470_s12 = smov 0   ;;  %s472_s13 = smov 0   ;;  %s509_s0 = inlined_call_operand.vmem [shape: f32[2,8,256], index: 0, kind: input, shape index: {}]   ;;  %s510_s1 = inlined_call_operand.vmem [shape: f32[8,8], index: 1, kind: input, shape index: {}]   ;;  %s511_s2 = inlined_call_operand.vmem [shape: f32[8,1], index: 2, kind: input, shape index: {}]   ;;  %s512_s3 = inlined_call_operand.vmem [shape: f32[2,8,256], index: 3, kind: output, shape index: {}]  }
   0x1   :  { %s474_s14 = smov 0  }
   0x2 LB: > { %s25_s15 = sadd.s32 1, %s442_s13  ;;  %p387_p0 = scmp.ge.s32.totalorder %s446_s14, 1  ;;  %s446_s14 = sphi %s474_s14, %s13_s14   ;;  %s442_s13 = sphi %s472_s13, %s514_s13   ;;  %s438_s12 = sphi %s470_s12, %s513_s12  }
   0x3   : > { %p27_p1 = scmp.ge.s32.totalorder %s25_s15, 2  ;;  %p158_p2 = scmp.lt.s32.totalorder %s446_s14, 3 }
   0x5   : > { %s516_s15 = smov (%p27_p1, %s25_s15), 0  ;;  %p159_p3 = pnand %p387_p0, %p158_p2 }
   0x6   : > { %p191_p4 = scmp.lt.s32.totalorder (!%p159_p3), %s438_s12, 1 }
   0x7   : > { %162 = sbr.rel (%p159_p3) target bundleno = 216 (0xd8), region = 32 }
   0xc   : > { %v213_v0 = vld [vmem:[%s511_s2] sm:$0xff]  ;;  %v448_v1 = vmov 0.0   ;;  %v449_v2 = vmov 0   ;;  %s518_s12 = smov (!%p191_p4, %s438_s12), 1  ;;  %vm219_vm0 = vcmask 64512  }
   0xd   : > { %287 = vmatprep.mubr.f32.mxu0 %v448_v1  ;;  %423 = vset.pattern.permute.xlu0 %v449_v2  ;;  %s395_s18 = sshll.u32 %s518_s12, 4  ;;  %v210_v5 = vld [vmem:[%s510_s1] sm:$0xff] }
   0xe   : > { %216 = vperm.xlu0 %423, %v213_v0   ;;  %s198_s21 = scalar_lea.vmem %s509_s0, %s395_s18  ;;  %s208_s26 = scalar_lea.vmem %s512_s3, %s395_s18 }
   0xf   : > { %v212_v3 = vld [vmem:[%s198_s21 + $0x8] sm:$0xff]  ;;  %v211_v4 = vld [vmem:[%s198_s21] sm:$0xff] }
  0x10   : > { %253 = vmatprep.subr.mxu0 %v212_v3 }
  0x11   : > { %254 = vmatpush1.msra.mxu0 %v211_v4 }
  0x12   : > { %392 = vmatmul.mubr.msk.f32.vlgmr.msra.gmra.mxu0 %vm219_vm0, %v210_v5 }
  0x89   : > { %v217_v6 = vpop.permute.xlu0 %216 }
  0xd2   : > { %v289_v7 = vpop.f32.mrf.mxu0 }
  0xd3   : > { %v290_v8 = vadd.f32 %v289_v7, %v217_v6 }
  0xd4   : > { %v291_v9 = vpop.f32.mrf.mxu0 }
  0xd5   : > { %294 = vst [vmem:[%s208_s26] sm:$0xff] %v290_v8  ;;  %v292_v10 = vadd.f32 %v291_v9, %v217_v6 }
  0xd7   : > { %295 = vst [vmem:[%s208_s26 + $0x8] sm:$0xff] %v292_v10 }
  0xd8 PF: > { %s13_s14 = sadd.s32 1, %s446_s14   ;;  %s513_s12 = smov %s442_s13 }
  0xd9   : > { %p10_p5 = scmp.ge.s32.totalorder %s13_s14, 4   ;;  %s514_s13 = smov %s516_s15 }
  0xdb   :  { %12 = sbr.rel (!%p10_p5) target bundleno = 2 (0x2), region = 62 }

</bundles_post_ra>
